<compile_context>
chip_gen: v7x
topology: tpu7x:2x2x1
jax: 0.10.0
libtpu: 0.0.40
codegen_flags: <defaults>
</compile_context>

<pallas_src>
import functools

import jax
import jax.numpy as jnp
from jax.experimental import pallas as pl
from jax.experimental.pallas import tpu as pltpu


D_PAD = 128  # lane-dense feature width for all layers


def _mlp_kernel(n_layers, x_ref, w_ref, b_ref, out_ref, h_ref):
    """x_ref: (block_b, D_PAD), w_ref: (L, D_PAD, D_PAD), b_ref: (L, 1, D_PAD),
    out_ref: (block_b, D_PAD), h_ref: VMEM scratch (block_b, D_PAD) f32."""
    # X.type_as(self.input_layer.weight): cast input to the parameter dtype (f32).
    h_ref[...] = x_ref[...].astype(jnp.float32)
    for l in range(n_layers - 1):
        h_ref[...] = (
            jnp.dot(h_ref[...], w_ref[l], preferred_element_type=jnp.float32)
            + b_ref[l]
        )
    last = n_layers - 1
    out_ref[...] = (
        jnp.dot(h_ref[...], w_ref[last], preferred_element_type=jnp.float32)
        + b_ref[last]
    ).astype(out_ref.dtype)


def mapping_model_forward(x, weights_t, biases, *, block_b=512):
    """Fused MLP forward.

    x:         (B, input_size) float array
    weights_t: list of (d_in_l, d_out_l) arrays (PyTorch weight transposed)
    biases:    list of (1, d_out_l) arrays
    Returns:   (B, output_size) float32, identical to the PyTorch forward.
    """
    B, d_in = x.shape
    n_layers = len(weights_t)
    out_dim = weights_t[-1].shape[1]
    assert d_in <= D_PAD and out_dim <= D_PAD
    for w in weights_t:
        assert w.shape[0] <= D_PAD and w.shape[1] <= D_PAD

    # --- Stack + zero-pad parameters to a single lane-dense (L, 128, 128) slab.
    w_stack = jnp.zeros((n_layers, D_PAD, D_PAD), jnp.float32)
    b_stack = jnp.zeros((n_layers, 1, D_PAD), jnp.float32)
    for l, (w, b) in enumerate(zip(weights_t, biases)):
        w_stack = w_stack.at[l, : w.shape[0], : w.shape[1]].set(
            w.astype(jnp.float32)
        )
        b_stack = b_stack.at[l, :, : b.shape[1]].set(b.astype(jnp.float32))

    # --- Large batch tile (multiple of 8), pad batch so the grid divides evenly.
    block_b = max(8, min(int(block_b), ((B + 7) // 8) * 8))
    block_b = (block_b // 8) * 8
    B_pad = ((B + block_b - 1) // block_b) * block_b
    x_p = jnp.zeros((B_pad, D_PAD), jnp.float32).at[:B, :d_in].set(
        x.astype(jnp.float32)
    )

    grid = (B_pad // block_b,)

    in_specs = [
        pl.BlockSpec((block_b, D_PAD), lambda i: (i, 0)),
        pl.BlockSpec((n_layers, D_PAD, D_PAD), lambda i: (0, 0, 0)),
        pl.BlockSpec((n_layers, 1, D_PAD), lambda i: (0, 0, 0)),
    ]
    out_spec = pl.BlockSpec((block_b, D_PAD), lambda i: (i, 0))

    out_padded = pl.pallas_call(
        functools.partial(_mlp_kernel, n_layers),
        out_shape=jax.ShapeDtypeStruct((B_pad, D_PAD), jnp.float32),
        grid=grid,
        in_specs=in_specs,
        out_specs=out_spec,
        scratch_shapes=[pltpu.VMEM((block_b, D_PAD), jnp.float32)],
        compiler_params=pltpu.CompilerParams(
            dimension_semantics=("parallel",),
        ),
    )(x_p, w_stack, b_stack)

    # Lane-dense padded output -> exact (B, out_dim) result.
    return out_padded[:B, :out_dim]


def init_mapping_model(key, input_size, hidden_sizes, output_size):
    """Deterministic parameter init mirroring the shapes of MappingModel.__init__."""
    dims = [input_size] + list(hidden_sizes) + [output_size]
    weights_t, biases = [], []
    for l in range(len(dims) - 1):
        d_in, d_out = dims[l], dims[l + 1]
        key, kw, kb = jax.random.split(key, 3)
        # PyTorch default nn.Linear init: U(-1/sqrt(fan_in), 1/sqrt(fan_in)).
        bound = 1.0 / (d_in ** 0.5)
        w = jax.random.uniform(kw, (d_out, d_in), jnp.float32, -bound, bound)
        b = jax.random.uniform(kb, (d_out,), jnp.float32, -bound, bound)
        weights_t.append(w.T)               # store transposed: (d_in, d_out)
        biases.append(b.reshape(1, d_out))  # (1, d_out)
    return weights_t, biases


def reference_forward(x, weights_t, biases):
    h = x.astype(jnp.float32)
    for w, b in zip(weights_t, biases):
        h = h @ w + b
    return h


if __name__ == "__main__":
    # Small shapes consistent with the module's forward.
    input_size = 32
    hidden_sizes = [64, 48]
    output_size = 16

    key = jax.random.PRNGKey(0)
    key, kx = jax.random.split(key)

    weights_t, biases = init_mapping_model(key, input_size, hidden_sizes, output_size)

    # Main test: default (large) batch tile, single grid step.
    batch = 16
    x = jax.random.normal(kx, (batch, input_size), dtype=jnp.float32)
    out = mapping_model_forward(x, weights_t, biases)
    out = jax.block_until_ready(out)
    ref = reference_forward(x, weights_t, biases)
    assert out.shape == (batch, output_size)
    assert jnp.allclose(out, ref, atol=1e-4, rtol=1e-4), "mismatch vs reference"

    # Secondary test: force a multi-step grid (exercises tiling + batch padding).
    batch2 = 20  # not a multiple of block_b -> padded rows sliced off
    key, kx2 = jax.random.split(key)
    x2 = jax.random.normal(kx2, (batch2, input_size), dtype=jnp.float32)
    out2 = mapping_model_forward(x2, weights_t, biases, block_b=8)
    out2 = jax.block_until_ready(out2)
    ref2 = reference_forward(x2, weights_t, biases)
    assert out2.shape == (batch2, output_size)
    assert jnp.allclose(out2, ref2, atol=1e-4, rtol=1e-4), "mismatch vs reference (tiled)"

    print("KERNEL_OK")
</pallas_src>

<mosaic_0001>
module attributes {stable_mosaic.version = 11 : i64} {
  func.func @_mlp_kernel(%arg0: i32, %arg1: memref<16x128xf32, #tpu.memory_space<vmem>>, %arg2: memref<3x128x128xf32, #tpu.memory_space<vmem>>, %arg3: memref<3x1x128xf32, #tpu.memory_space<vmem>>, %arg4: memref<16x128xf32, #tpu.memory_space<vmem>>, %arg5: memref<16x128xf32, #tpu.memory_space<vmem>>) attributes {dimension_semantics = [#tpu.dimension_semantics<parallel>], iteration_bounds = array<i64: 1>, scalar_prefetch = 0 : i64, scratch_operands = 1 : i64, tpu.core_type = #tpu.core_type<tc>, window_params = [{transform_indices = @transform_0, window_bounds = array<i64: 16, 128>}, {pipeline_mode = #tpu.pipeline_mode<synchronous>, transform_indices = @transform_1, window_bounds = array<i64: 3, 128, 128>}, {pipeline_mode = #tpu.pipeline_mode<synchronous>, transform_indices = @transform_2, window_bounds = array<i64: 3, 1, 128>}, {transform_indices = @transform_3, window_bounds = array<i64: 16, 128>}]} {
    %c0 = arith.constant 0 : index
    %c0_0 = arith.constant 0 : index
    %0 = vector.load %arg1[%c0, %c0_0] : memref<16x128xf32, #tpu.memory_space<vmem>>, vector<16x128xf32>
    %c0_1 = arith.constant 0 : index
    %c0_2 = arith.constant 0 : index
    %1 = vector.load %arg5[%c0_1, %c0_2] : memref<16x128xf32, #tpu.memory_space<vmem>>, vector<16x128xf32>
    tpu.vector_store %arg5[%c0_1, %c0_2], %0 {strides = array<i32>} : memref<16x128xf32, #tpu.memory_space<vmem>>, vector<16x128xf32>,
    %c0_3 = arith.constant 0 : index
    %c0_4 = arith.constant 0 : index
    %2 = vector.load %arg5[%c0_3, %c0_4] : memref<16x128xf32, #tpu.memory_space<vmem>>, vector<16x128xf32>
    %c0_5 = arith.constant 0 : index
    %c0_6 = arith.constant 0 : index
    %c0_7 = arith.constant 0 : index
    %3 = vector.load %arg2[%c0_5, %c0_6, %c0_7] : memref<3x128x128xf32, #tpu.memory_space<vmem>>, vector<1x128x128xf32>
    %4 = vector.shape_cast %3 : vector<1x128x128xf32> to vector<128x128xf32>
    %cst = arith.constant dense<0.000000e+00> : vector<16x128xf32>
    %5 = tpu.matmul %2, %4, %cst {dimension_numbers = #tpu.dot_dimension_numbers<[1], [0], [0], [1], [0, 0, 1, 1], [], []>} : vector<16x128xf32>, vector<128x128xf32>, vector<16x128xf32> -> vector<16x128xf32>
    %c0_8 = arith.constant 0 : index
    %c0_9 = arith.constant 0 : index
    %c0_10 = arith.constant 0 : index
    %6 = vector.load %arg3[%c0_8, %c0_9, %c0_10] : memref<3x1x128xf32, #tpu.memory_space<vmem>>, vector<1x1x128xf32>
    %7 = vector.shape_cast %6 : vector<1x1x128xf32> to vector<1x128xf32>
    %8 = vector.broadcast %7 : vector<1x128xf32> to vector<16x128xf32>
    %9 = arith.addf %5, %8 : vector<16x128xf32>
    %c0_11 = arith.constant 0 : index
    %c0_12 = arith.constant 0 : index
    %10 = vector.load %arg5[%c0_11, %c0_12] : memref<16x128xf32, #tpu.memory_space<vmem>>, vector<16x128xf32>
    tpu.vector_store %arg5[%c0_11, %c0_12], %9 {strides = array<i32>} : memref<16x128xf32, #tpu.memory_space<vmem>>, vector<16x128xf32>,
    %c0_13 = arith.constant 0 : index
    %c0_14 = arith.constant 0 : index
    %11 = vector.load %arg5[%c0_13, %c0_14] : memref<16x128xf32, #tpu.memory_space<vmem>>, vector<16x128xf32>
    %c1 = arith.constant 1 : index
    %c0_15 = arith.constant 0 : index
    %c0_16 = arith.constant 0 : index
    %12 = vector.load %arg2[%c1, %c0_15, %c0_16] : memref<3x128x128xf32, #tpu.memory_space<vmem>>, vector<1x128x128xf32>
    %13 = vector.shape_cast %12 : vector<1x128x128xf32> to vector<128x128xf32>
    %cst_17 = arith.constant dense<0.000000e+00> : vector<16x128xf32>
    %14 = tpu.matmul %11, %13, %cst_17 {dimension_numbers = #tpu.dot_dimension_numbers<[1], [0], [0], [1], [0, 0, 1, 1], [], []>} : vector<16x128xf32>, vector<128x128xf32>, vector<16x128xf32> -> vector<16x128xf32>
    %c1_18 = arith.constant 1 : index
    %c0_19 = arith.constant 0 : index
    %c0_20 = arith.constant 0 : index
    %15 = vector.load %arg3[%c1_18, %c0_19, %c0_20] : memref<3x1x128xf32, #tpu.memory_space<vmem>>, vector<1x1x128xf32>
    %16 = vector.shape_cast %15 : vector<1x1x128xf32> to vector<1x128xf32>
    %17 = vector.broadcast %16 : vector<1x128xf32> to vector<16x128xf32>
    %18 = arith.addf %14, %17 : vector<16x128xf32>
    %c0_21 = arith.constant 0 : index
    %c0_22 = arith.constant 0 : index
    %19 = vector.load %arg5[%c0_21, %c0_22] : memref<16x128xf32, #tpu.memory_space<vmem>>, vector<16x128xf32>
    tpu.vector_store %arg5[%c0_21, %c0_22], %18 {strides = array<i32>} : memref<16x128xf32, #tpu.memory_space<vmem>>, vector<16x128xf32>,
    %c0_23 = arith.constant 0 : index
    %c0_24 = arith.constant 0 : index
    %20 = vector.load %arg5[%c0_23, %c0_24] : memref<16x128xf32, #tpu.memory_space<vmem>>, vector<16x128xf32>
    %c2 = arith.constant 2 : index
    %c0_25 = arith.constant 0 : index
    %c0_26 = arith.constant 0 : index
    %21 = vector.load %arg2[%c2, %c0_25, %c0_26] : memref<3x128x128xf32, #tpu.memory_space<vmem>>, vector<1x128x128xf32>
    %22 = vector.shape_cast %21 : vector<1x128x128xf32> to vector<128x128xf32>
    %cst_27 = arith.constant dense<0.000000e+00> : vector<16x128xf32>
    %23 = tpu.matmul %20, %22, %cst_27 {dimension_numbers = #tpu.dot_dimension_numbers<[1], [0], [0], [1], [0, 0, 1, 1], [], []>} : vector<16x128xf32>, vector<128x128xf32>, vector<16x128xf32> -> vector<16x128xf32>
    %c2_28 = arith.constant 2 : index
    %c0_29 = arith.constant 0 : index
    %c0_30 = arith.constant 0 : index
    %24 = vector.load %arg3[%c2_28, %c0_29, %c0_30] : memref<3x1x128xf32, #tpu.memory_space<vmem>>, vector<1x1x128xf32>
    %25 = vector.shape_cast %24 : vector<1x1x128xf32> to vector<1x128xf32>
    %26 = vector.broadcast %25 : vector<1x128xf32> to vector<16x128xf32>
    %27 = arith.addf %23, %26 : vector<16x128xf32>
    %c0_31 = arith.constant 0 : index
    %c0_32 = arith.constant 0 : index
    %28 = vector.load %arg4[%c0_31, %c0_32] : memref<16x128xf32, #tpu.memory_space<vmem>>, vector<16x128xf32>
    tpu.vector_store %arg4[%c0_31, %c0_32], %27 {strides = array<i32>} : memref<16x128xf32, #tpu.memory_space<vmem>>, vector<16x128xf32>,
    return
  }
  func.func @transform_0(%arg0: i32) -> (i32, i32) {
    %c0_i32 = arith.constant 0 : i32
    %c0_i32_0 = arith.constant 0 : i32
    return %arg0, %c0_i32 : i32, i32
  }
  func.func @transform_1(%arg0: i32) -> (i32, i32, i32) {
    %c0_i32 = arith.constant 0 : i32
    %c0_i32_0 = arith.constant 0 : i32
    %c0_i32_1 = arith.constant 0 : i32
    %c0_i32_2 = arith.constant 0 : i32
    return %c0_i32, %c0_i32_0, %c0_i32_1 : i32, i32, i32
  }
  func.func @transform_2(%arg0: i32) -> (i32, i32, i32) {
    %c0_i32 = arith.constant 0 : i32
    %c0_i32_0 = arith.constant 0 : i32
    %c0_i32_1 = arith.constant 0 : i32
    %c0_i32_2 = arith.constant 0 : i32
    return %c0_i32, %c0_i32_0, %c0_i32_1 : i32, i32, i32
  }
  func.func @transform_3(%arg0: i32) -> (i32, i32) {
    %c0_i32 = arith.constant 0 : i32
    %c0_i32_0 = arith.constant 0 : i32
    return %arg0, %c0_i32 : i32, i32
  }
}

</mosaic_0001>

<bundles_post_ra>
// kernel: tpu_custom_call.1
= control target key start
LH: loop header
LB: loop body
LE: loop exit
PB: predicated region body
PF: predicated region fallthrough
CT: control target
= control target key end

     0   :  { %8 = vsyncpa [#allocation4], 0  ;;  %s791_s0 = inlined_call_operand.hbm [shape: f32[16,128], index: 0, kind: input, shape index: {}]   ;;  %s792_s1 = inlined_call_operand.hbm [shape: f32[3,128,128], index: 1, kind: input, shape index: {}]   ;;  %s793_s2 = inlined_call_operand.vmem [shape: f32[3,1,128], index: 2, kind: input, shape index: {}]   ;;  %s794_s3 = inlined_call_operand.hbm [shape: f32[16,128], index: 3, kind: output, shape index: {}]  }
   0x1   :  { %9 = vsyncpa [#allocation7], 0 }
   0x2   :  { %10 = vsyncpa [#allocation5], 0  ;;  %s712_s12 = smov [#allocation3]   ;;  %s640_s16 = scalar_lea.hbm %s791_s0, 256 }
   0x3   :  { %s16_s13 = sshll.u32 %s712_s12, 4  ;;  %p641_p0 = scmp.ne.s32.totalorder %s791_s0, %s640_s16  ;;  %s17_s13 = int_to_ptr.vmem [resolvable:$true] %s16_s13 }
   0x4   :  { %p644_p1 = scmp.lt.u32.totalorder %s640_s16, %s791_s0 }
   0x6   :  { %p646_p2 = pnand %p644_p1, %p641_p0 }
   0x8   :  { %649 = shalt.err (!%p646_p2)
}
   0x9   :  { %s650_s21 = scalar_lea.vmem %s17_s13, 256  ;;  %p655_p4 = scmp.lt.s32.totalorder %s17_s13, %s17_s13 }
   0xa   :  { %p651_p3 = scmp.ne.s32.totalorder %s17_s13, %s650_s21  ;;  %p656_p5 = scmp.lt.s32.totalorder %s650_s21, %s650_s21 }
   0xc   :  { %p657_p6 = por %p656_p5, %p655_p4 }
   0xe   :  { %p658_p7 = pnand %p657_p6, %p651_p3 }
  0x10   :  { %661 = shalt.err (!%p658_p7)
}
  0x11   :  { %s713_s22 = smov 128   ;;  %s714_s23 = smov 8  }
  0x12   :  { %22 = dma.hbm_to_vmem [thread:$0]  %s791_s0, 256, %s17_s13, [#allocation4], %s713_s22, %s713_s22, %s714_s23  }
  0x13   :  { %s715_s26 = smov [#allocation6]   ;;  %s662_s30 = scalar_lea.hbm %s792_s1, 6144 }
  0x14   :  { %s28_s27 = sshll.u32 %s715_s26, 4  ;;  %p663_p8 = scmp.ne.s32.totalorder %s792_s1, %s662_s30  ;;  %s29_s27 = int_to_ptr.vmem [resolvable:$true] %s28_s27 }
  0x15   :  { %p666_p9 = scmp.lt.u32.totalorder %s662_s30, %s792_s1 }
  0x17   :  { %p668_p10 = pnand %p666_p9, %p663_p8 }
  0x19   :  { %671 = shalt.err (!%p668_p10)
}
  0x1a   :  { %s672_s8 = scalar_lea.vmem %s29_s27, 6144  ;;  %p677_p12 = scmp.lt.s32.totalorder %s29_s27, %s29_s27 }
  0x1b   :  { %p673_p11 = scmp.ne.s32.totalorder %s29_s27, %s672_s8  ;;  %p678_p13 = scmp.lt.s32.totalorder %s672_s8, %s672_s8 }
  0x1d   :  { %p679_p0 = por %p678_p13, %p677_p12 }
  0x1f   :  { %p680_p1 = pnand %p679_p0, %p673_p11 }
  0x21   :  { %683 = shalt.err (!%p680_p1)
}
  0x22   :  { %34 = dma.hbm_to_vmem [thread:$0]  %s792_s1, 6144, %s29_s27, [#allocation7], %s713_s22, %s713_s22, %s714_s23  }
  0x23   :  { %706 = dma.done.wait [#allocation4], 256  }
  0x24   :  { %707 = vsyncadd [#allocation4], 4294967040 }
  0x25   :  { %708 = dma.done.wait [#allocation7], 6144  }
  0x26   :  { %709 = vsyncadd [#allocation7], 4294961152  ;;  %v49_v0 = vld [vmem:[#allocation6] sm:$0xff]  ;;  %v50_v1 = vld [vmem:[#allocation6 + $0x8] sm:$0xff]  ;;  %s716_s15 = smov [#allocation8]  }
  0x27   :  { %v51_v2 = vld [vmem:[#allocation6 + $0x10] sm:$0xff]  ;;  %v539_v3 = vpack.c.bf16 %v50_v1, %v49_v0  ;;  %v52_v4 = vld [vmem:[#allocation6 + $0x18] sm:$0xff]  ;;  %v53_v6 = vld [vmem:[#allocation6 + $0x20] sm:$0xff]  ;;  %s362_s16 = sshll.u32 %s716_s15, 4  ;;  %s363_s16 = int_to_ptr.vmem [resolvable:$true] %s362_s16 }
  0x28   :  { %v543_v5 = vpack.c.bf16 %v52_v4, %v51_v2  ;;  %v54_v7 = vld [vmem:[#allocation6 + $0x28] sm:$0xff]  ;;  %v55_v9 = vld [vmem:[#allocation6 + $0x30] sm:$0xff]  ;;  %v56_v10 = vld [vmem:[#allocation6 + $0x38] sm:$0xff]  ;;  %s684_s17 = scalar_lea.vmem %s363_s16, 256  ;;  %p689_p3 = scmp.lt.s32.totalorder %s363_s16, %s363_s16 }
  0x29   :  { %540 = vmatprep.subr.bf16.mxu0 %v539_v3  ;;  %v547_v8 = vpack.c.bf16 %v54_v7, %v53_v6  ;;  %v43_v11 = vld [vmem:[#allocation3] sm:$0xff]  ;;  %v152_v12 = vld [vmem:[#allocation6 + $0x80] sm:$0xff]  ;;  %v153_v13 = vld [vmem:[#allocation6 + $0x88] sm:$0xff]  ;;  %v551_v20 = vpack.c.bf16 %v56_v10, %v55_v9  ;;  %p685_p2 = scmp.ne.s32.totalorder %s363_s16, %s684_s17  ;;  %p690_p4 = scmp.lt.s32.totalorder %s684_s17, %s684_s17 }
  0x2a   :  { %542 = vmatpush3.bf16.msra.mxu0 %v539_v3  ;;  %466 = vmatprep.mubr.f32.mxu0 %v43_v11  ;;  %v154_v14 = vld [vmem:[#allocation6 + $0x90] sm:$0xff]  ;;  %v571_v15 = vpack.c.bf16 %v153_v13, %v152_v12  ;;  %v155_v16 = vld [vmem:[#allocation6 + $0x98] sm:$0xff]  ;;  %v156_v18 = vld [vmem:[#allocation6 + $0xa0] sm:$0xff] }
  0x2b   :  { %544 = vmatprep.subr.bf16.mxu0 %v543_v5  ;;  %v575_v17 = vpack.c.bf16 %v155_v16, %v154_v14  ;;  %v157_v19 = vld [vmem:[#allocation6 + $0xa8] sm:$0xff]  ;;  %v57_v21 = vld [vmem:[#allocation6 + $0x40] sm:$0xff]  ;;  %v158_v24 = vld [vmem:[#allocation6 + $0xb0] sm:$0xff]  ;;  %p691_p5 = por %p690_p4, %p689_p3 }
  0x2c   :  { %572 = vmatprep.subr.bf16.mxu1 %v571_v15  ;;  %v58_v22 = vld [vmem:[#allocation6 + $0x48] sm:$0xff]  ;;  %v579_v23 = vpack.c.bf16 %v157_v19, %v156_v18  ;;  %v159_v25 = vld [vmem:[#allocation6 + $0xb8] sm:$0xff]  ;;  %v59_v27 = vld [vmem:[#allocation6 + $0x50] sm:$0xff] }
  0x2d   :  { %574 = vmatpush3.bf16.msra.mxu1 %v571_v15  ;;  %v555_v26 = vpack.c.bf16 %v58_v22, %v57_v21  ;;  %v60_v28 = vld [vmem:[#allocation6 + $0x58] sm:$0xff]  ;;  %v583_v29 = vpack.c.bf16 %v159_v25, %v158_v24  ;;  %v160_v30 = vld [vmem:[#allocation6 + $0xc0] sm:$0xff]  ;;  %v161_v31 = vld [vmem:[#allocation6 + $0xc8] sm:$0xff]  ;;  %p692_p6 = pnand %p691_p5, %p685_p2 }
  0x2e   :  { %546 = vmatpush3.bf16.msra.mxu0 %v543_v5  ;;  %576 = vmatprep.subr.bf16.mxu1 %v575_v17  ;;  %v559_v32 = vpack.c.bf16 %v60_v28, %v59_v27  ;;  %v61_v33 = vld [vmem:[#allocation6 + $0x60] sm:$0xff]  ;;  %v62_v34 = vld [vmem:[#allocation6 + $0x68] sm:$0xff]  ;;  %v587_v35 = vpack.c.bf16 %v161_v31, %v160_v30  ;;  %v162_v36 = vld [vmem:[#allocation6 + $0xd0] sm:$0xff] }
  0x2f   :  { %548 = vmatprep.subr.bf16.mxu0 %v547_v8  ;;  %v163_v37 = vld [vmem:[#allocation6 + $0xd8] sm:$0xff]  ;;  %v563_v38 = vpack.c.bf16 %v62_v34, %v61_v33  ;;  %v63_v39 = vld [vmem:[#allocation6 + $0x70] sm:$0xff]  ;;  %v164_v42 = vld [vmem:[#allocation6 + $0xe0] sm:$0xff] }
  0x30   :  { %v64_v40 = vld [vmem:[#allocation6 + $0x78] sm:$0xff]  ;;  %v591_v41 = vpack.c.bf16 %v163_v37, %v162_v36  ;;  %v165_v43 = vld [vmem:[#allocation6 + $0xe8] sm:$0xff]  ;;  %v166_v47 = vld [vmem:[#allocation6 + $0xf0] sm:$0xff] }
  0x31   :  { %578 = vmatpush3.bf16.msra.mxu1 %v575_v17  ;;  %v567_v44 = vpack.c.bf16 %v64_v40, %v63_v39  ;;  %v595_v45 = vpack.c.bf16 %v165_v43, %v164_v42  ;;  %v44_v46 = vld [vmem:[#allocation3 + $0x8] sm:$0xff]  ;;  %v256_v50 = vld [vmem:[#allocation6 + $0x100] sm:$0xff]  ;;  %v257_v51 = vld [vmem:[#allocation6 + $0x108] sm:$0xff] }
  0x32   :  { %550 = vmatpush3.bf16.msra.mxu0 %v547_v8  ;;  %580 = vmatprep.subr.bf16.mxu1 %v579_v23  ;;  %v167_v48 = vld [vmem:[#allocation6 + $0xf8] sm:$0xff]  ;;  %v258_v52 = vld [vmem:[#allocation6 + $0x110] sm:$0xff]  ;;  %v603_v53 = vpack.c.bf16 %v257_v51, %v256_v50  ;;  %v260_v56 = vld [vmem:[#allocation6 + $0x120] sm:$0xff] }
  0x33   :  { %552 = vmatprep.subr.bf16.mxu0 %v551_v20  ;;  %v599_v49 = vpack.c.bf16 %v167_v48, %v166_v47  ;;  %v259_v54 = vld [vmem:[#allocation6 + $0x118] sm:$0xff]  ;;  %v261_v57 = vld [vmem:[#allocation6 + $0x128] sm:$0xff]  ;;  %v262_v59 = vld [vmem:[#allocation6 + $0x130] sm:$0xff] }
  0x34   :  { %v607_v55 = vpack.c.bf16 %v259_v54, %v258_v52  ;;  %v611_v58 = vpack.c.bf16 %v261_v57, %v260_v56  ;;  %v263_v60 = vld [vmem:[#allocation6 + $0x138] sm:$0xff]  ;;  %v264_v62 = vld [vmem:[#allocation6 + $0x140] sm:$0xff]  ;;  %v265_v63 = vld [vmem:[#allocation6 + $0x148] sm:$0xff] }
  0x35   :  { %582 = vmatpush3.bf16.msra.mxu1 %v579_v23  ;;  %v615_v61 = vpack.c.bf16 %v263_v60, %v262_v59  ;;  %v619_v0 = vpack.c.bf16 %v265_v63, %v264_v62  ;;  %v266_v1 = vld [vmem:[#allocation6 + $0x150] sm:$0xff]  ;;  %v267_v2 = vld [vmem:[#allocation6 + $0x158] sm:$0xff]  ;;  %v268_v4 = vld [vmem:[#allocation6 + $0x160] sm:$0xff] }
  0x36   :  { %554 = vmatpush3.bf16.msra.mxu0 %v551_v20  ;;  %584 = vmatprep.subr.bf16.mxu1 %v583_v29  ;;  %v623_v3 = vpack.c.bf16 %v267_v2, %v266_v1  ;;  %v269_v5 = vld [vmem:[#allocation6 + $0x168] sm:$0xff]  ;;  %v375_v7 = vld [vmem:[%s793_s2] ss:$0 sm:$0xff]  ;;  %v271_v13 = vld [vmem:[#allocation6 + $0x178] sm:$0xff] }
  0x37   :  { %556 = vmatprep.subr.bf16.mxu0 %v555_v26  ;;  %v627_v6 = vpack.c.bf16 %v269_v5, %v268_v4  ;;  %v270_v12 = vld [vmem:[#allocation6 + $0x170] sm:$0xff] }
  0x38   :  { %v631_v14 = vpack.c.bf16 %v271_v13, %v270_v12  ;;  %v377_v15 = vld [vmem:[%s793_s2 + $0x1] ss:$0 sm:$0xff]  ;;  %v379_v20 = vld [vmem:[%s793_s2 + $0x2] ss:$0 sm:$0xff] }
  0x39   :  { %586 = vmatpush3.bf16.msra.mxu1 %v583_v29 }
  0x3a   :  { %558 = vmatpush3.bf16.msra.mxu0 %v555_v26  ;;  %588 = vmatprep.subr.bf16.mxu1 %v587_v35 }
  0x3b   :  { %560 = vmatprep.subr.bf16.mxu0 %v559_v32 }
  0x3d   :  { %590 = vmatpush3.bf16.msra.mxu1 %v587_v35 }
  0x3e   :  { %562 = vmatpush3.bf16.msra.mxu0 %v559_v32  ;;  %592 = vmatprep.subr.bf16.mxu1 %v591_v41 }
  0x3f   :  { %564 = vmatprep.subr.bf16.mxu0 %v563_v38 }
  0x41   :  { %594 = vmatpush3.bf16.msra.mxu1 %v591_v41 }
  0x42   :  { %566 = vmatpush3.bf16.msra.mxu0 %v563_v38  ;;  %596 = vmatprep.subr.bf16.mxu1 %v595_v45 }
  0x43   :  { %568 = vmatprep.subr.bf16.mxu0 %v567_v44 }
  0x45   :  { %598 = vmatpush3.bf16.msra.mxu1 %v595_v45 }
  0x46   :  { %570 = vmatpush3.bf16.msra.mxu0 %v567_v44  ;;  %600 = vmatprep.subr.bf16.mxu1 %v599_v49 }
  0x47   :  { %604 = vmatprep.subr.bf16.mxu0 %v603_v53 }
  0x49   :  { %467 = vmatmul.mubr.f32.vlgmr.msra.gmra.mrb[0].mxu0 %v44_v46  ;;  %602 = vmatpush3.bf16.msra.mxu1 %v599_v49 }
  0x4a   :  { %606 = vmatpush3.bf16.msra.mxu0 %v603_v53 }
  0x4b   :  { %608 = vmatprep.subr.bf16.mxu0 %v607_v55 }
  0x4e   :  { %610 = vmatpush3.bf16.msra.mxu0 %v607_v55 }
  0x4f   :  { %612 = vmatprep.subr.bf16.mxu0 %v611_v58 }
  0x52   :  { %614 = vmatpush3.bf16.msra.mxu0 %v611_v58 }
  0x53   :  { %616 = vmatprep.subr.bf16.mxu0 %v615_v61 }
  0x56   :  { %618 = vmatpush3.bf16.msra.mxu0 %v615_v61 }
  0x57   :  { %620 = vmatprep.subr.bf16.mxu0 %v619_v0 }
  0x5a   :  { %622 = vmatpush3.bf16.msra.mxu0 %v619_v0 }
  0x5b   :  { %624 = vmatprep.subr.bf16.mxu0 %v623_v3 }
  0x5e   :  { %626 = vmatpush3.bf16.msra.mxu0 %v623_v3 }
  0x5f   :  { %628 = vmatprep.subr.bf16.mxu0 %v627_v6 }
  0x62   :  { %630 = vmatpush3.bf16.msra.mxu0 %v627_v6 }
  0x63   :  { %632 = vmatprep.subr.bf16.mxu0 %v631_v14 }
  0x66   :  { %634 = vmatpush3.bf16.msra.mxu0 %v631_v14 }
 0x11c   :  { %v468_v8 = vpop.f32.mrb[0].mxu0 }
 0x11d   :  { %v138_v9 = vpop.f32.mrb[1].mxu0  ;;  %v144_v11 = vadd.f32 %v468_v8, %v375_v7 }
 0x11e   :  { %v139_v10 = vadd.f32 %v375_v7, %v138_v9 }
 0x120   :  { %501 = vmatprep.mubr.f32.mxu1 %v139_v10 }
 0x121   :  { %502 = vmatmul.mubr.f32.vlgmr.msra.gmra.mrb[0].mxu1 %v144_v11 }
 0x1f4   :  { %v503_v16 = vpop.f32.mrb[0].mxu1 }
 0x1f5   :  { %v242_v17 = vpop.f32.mrb[1].mxu1  ;;  %v248_v19 = vadd.f32 %v503_v16, %v377_v15 }
 0x1f6   :  { %v243_v18 = vadd.f32 %v377_v15, %v242_v17 }
 0x1f8   :  { %536 = vmatprep.mubr.f32.mxu0 %v243_v18 }
 0x1f9   :  { %537 = vmatmul.mubr.f32.vlgmr.msra.gmra.mrb[2].mxu0 %v248_v19 }
 0x2cc   :  { %v538_v21 = vpop.f32.mrb[2].mxu0 }
 0x2cd   :  { %v352_v22 = vadd.f32 %v538_v21, %v379_v20  ;;  %v346_v23 = vpop.f32.mrb[3].mxu0 }
 0x2ce   :  { %v347_v24 = vadd.f32 %v379_v20, %v346_v23 }
 0x2cf   :  { %356 = vst [vmem:[#allocation8 + $0x8] sm:$0xff] %v352_v22 }
 0x2d0   :  { %355 = vst [vmem:[#allocation8] sm:$0xff] %v347_v24 }
 0x2d1   :  { %695 = shalt.err (!%p692_p6)
}
 0x2d2   :  { %s696_s2 = scalar_lea.hbm %s794_s3, 256 }
 0x2d3   :  { %p697_p7 = scmp.ne.s32.totalorder %s794_s3, %s696_s2  ;;  %p700_p8 = scmp.lt.u32.totalorder %s696_s2, %s794_s3 }
 0x2d5   :  { %p702_p9 = pnand %p700_p8, %p697_p7 }
 0x2d7   :  { %705 = shalt.err (!%p702_p9)
}
 0x2d8   :  { %368 = dma.vmem_to_hbm [thread:$0]  %s363_s16, 256, %s794_s3, [#allocation5], %s713_s22, %s713_s22, %s714_s23  }
 0x2d9   :  { %710 = dma.done.wait [#allocation5], 256  }
 0x2da   :  { %711 = vsyncadd [#allocation5], 4294967040 }
 0x2db   :  { %372 = vsyncpa [#allocation4], 1 }
 0x2dc   :  { %373 = vsyncpa [#allocation7], 1 }
 0x2dd   :  { %374 = vsyncpa [#allocation5], 1 }

</bundles_post_ra>
